<compile_context>
chip_gen: v7x
topology: tpu7x:2x2x1
jax: 0.10.0
libtpu: 0.0.40
codegen_flags: <defaults>
</compile_context>

<pallas_src>
import functools

import jax
import jax.numpy as jnp
from jax.experimental import pallas as pl
from jax.experimental.pallas import tpu as pltpu

BN_EPS = 1e-5


def _round_up(v, m):
    return (v + m - 1) // m * m


# --------------------------------------------------------------------------
# Fused kernel (small problems): matmul + BN stats + normalize + ReLU,
# the (N, M) linear output never leaves VMEM.
# --------------------------------------------------------------------------
def _fused_linear_bn_relu_kernel(x_ref, wt_ref, gamma_ref, beta_ref, o_ref,
                                 acc_ref, *, n_valid):
    # program_id/num_programs only at kernel top level (never inside pl.when).
    k = pl.program_id(0)
    nk = pl.num_programs(0)

    @pl.when(k == 0)
    def _init():
        acc_ref[...] = jnp.zeros_like(acc_ref)

    acc_ref[...] += jnp.dot(x_ref[...], wt_ref[...],
                            preferred_element_type=jnp.float32)

    @pl.when(k == nk - 1)
    def _finalize():
        y = acc_ref[...]                                   # (NP, MP) f32, resident
        valid = jax.lax.broadcasted_iota(jnp.int32, y.shape, 0) < n_valid
        inv_n = 1.0 / n_valid
        mean = jnp.sum(jnp.where(valid, y, 0.0), axis=0, keepdims=True) * inv_n
        centered = jnp.where(valid, y - mean, 0.0)
        var = jnp.sum(centered * centered, axis=0, keepdims=True) * inv_n
        scale = gamma_ref[...] * jax.lax.rsqrt(var + BN_EPS)
        shift = beta_ref[...] - mean * scale
        z = jnp.maximum(y * scale + shift, 0.0)
        o_ref[...] = z[:, : o_ref.shape[-1]].astype(o_ref.dtype)


# --------------------------------------------------------------------------
# Pass 1 (large problems): tiled MXU matmul + per-tile BN partial statistics.
# --------------------------------------------------------------------------
def _matmul_stats_kernel(x_ref, wt_ref, y_ref, stats_ref, acc_ref, *, tm, n_valid):
    i = pl.program_id(0)
    k = pl.program_id(2)
    nk = pl.num_programs(2)

    @pl.when(k == 0)
    def _init():
        acc_ref[...] = jnp.zeros_like(acc_ref)

    acc_ref[...] += jnp.dot(x_ref[...], wt_ref[...],
                            preferred_element_type=jnp.float32)

    @pl.when(k == nk - 1)
    def _finalize():
        y = acc_ref[...]                                   # (tm, tn) f32
        y_ref[...] = y.astype(y_ref.dtype)                 # bf16 intermediate

        # Per-(row-tile, col-tile) stats, centred per tile for a numerically
        # stable merge in the glue. Padded rows of (B*S) are masked out.
        row = i * tm + jax.lax.broadcasted_iota(jnp.int32, y.shape, 0)
        valid = row < n_valid
        n_t = jnp.maximum(jnp.minimum(tm, n_valid - i * tm), 1).astype(jnp.float32)
        tile_sum = jnp.sum(jnp.where(valid, y, 0.0), axis=0, keepdims=True)
        tile_mean = tile_sum / n_t
        centered = jnp.where(valid, y - tile_mean, 0.0)
        tile_ssd = jnp.sum(centered * centered, axis=0, keepdims=True)

        # Single full-tile store (rows 0/1 carry sum/ssd, rest zero).
        tn = tile_sum.shape[-1]
        row_id = jax.lax.broadcasted_iota(jnp.int32, (8, tn), 0)
        stats_ref[...] = jnp.where(
            row_id == 0, jnp.broadcast_to(tile_sum, (8, tn)),
            jnp.where(row_id == 1, jnp.broadcast_to(tile_ssd, (8, tn)), 0.0))


# --------------------------------------------------------------------------
# Pass 2: streaming y*scale + shift, ReLU.  Unpadded, lane-dense output.
# --------------------------------------------------------------------------
def _bn_relu_kernel(y_ref, scale_ref, shift_ref, o_ref):
    y = y_ref[...].astype(jnp.float32)                     # upcast in-register
    z = jnp.maximum(y * scale_ref[...] + shift_ref[...], 0.0)
    o_ref[...] = z[:, : o_ref.shape[-1]].astype(o_ref.dtype)


@functools.partial(jax.jit, static_argnames=("matmul_dtype",))
def linear_block(x, weight, bias, gamma, beta, *, matmul_dtype=jnp.bfloat16):
    """x: (B, S, in_features) -> (B, S, out_features), f32 output.

    Linear -> permute -> BatchNorm1d (training statistics over B*S) -> permute
    -> ReLU, dropout_p = 0.  `bias` is accepted for signature parity but not
    added: it cancels exactly in training-mode BatchNorm's forward output.
    """
    del bias  # exact cancellation: mean/var of (Wx + b) shift out the bias
    B, S, K = x.shape
    M = weight.shape[0]
    N = B * S

    compute_dtype = jnp.dtype(matmul_dtype)
    itemsize = compute_dtype.itemsize

    # Lane-dense padding targets: features x128, rows x8.
    NP = _round_up(N, 8)
    MP = _round_up(M, 128)
    KP = _round_up(K, 128)

    # K tile: largest of {1024, 512, 256, 128} dividing KP (no K padding waste).
    TK = 1024
    while TK > 128 and KP % TK:
        TK //= 2
    nk = KP // TK

    x2d = x.reshape(N, K).astype(compute_dtype)            # cast BEFORE padding
    wt = weight.T.astype(compute_dtype)
    gamma_f = gamma.astype(jnp.float32)
    beta_f = beta.astype(jnp.float32)

    # ---------------- fused single-kernel path for small problems ----------
    if NP <= 1024 and MP <= 1024:
        if (NP, KP) != (N, K):
            x2d = jnp.pad(x2d, ((0, NP - N), (0, KP - K)))
        if (KP, MP) != (K, M):
            wt = jnp.pad(wt, ((0, KP - K), (0, MP - M)))
        if MP != M:
            gamma_f = jnp.pad(gamma_f, (0, MP - M))
            beta_f = jnp.pad(beta_f, (0, MP - M))
        gamma2d = gamma_f.reshape(1, MP)
        beta2d = beta_f.reshape(1, MP)

        est = (2 * (NP * TK + TK * MP) * itemsize + 2 * NP * M * 4
               + 4 * MP * 4 + NP * MP * 4)
        vmem = int(min(48 * 2**20, max(32 * 2**20, 2 * est)))

        out2d = pl.pallas_call(
            functools.partial(_fused_linear_bn_relu_kernel, n_valid=N),
            out_shape=jax.ShapeDtypeStruct((N, M), jnp.float32),
            grid=(nk,),
            in_specs=[
                pl.BlockSpec((NP, TK), lambda k: (0, k)),
                pl.BlockSpec((TK, MP), lambda k: (k, 0)),
                pl.BlockSpec((1, MP), lambda k: (0, 0)),
                pl.BlockSpec((1, MP), lambda k: (0, 0)),
            ],
            out_specs=pl.BlockSpec((NP, M), lambda k: (0, 0)),
            scratch_shapes=[pltpu.VMEM((NP, MP), jnp.float32)],
            compiler_params=pltpu.CompilerParams(
                dimension_semantics=("arbitrary",),
                vmem_limit_bytes=vmem,
            ),
        )(x2d, wt, gamma2d, beta2d)
        return out2d.reshape(B, S, M)

    # ---------------- two-pass path for large problems ---------------------
    # pass 1 tiles: rows x512, cols = largest of {512,256,128} dividing MP.
    TM = min(512, NP)
    TN = 512
    while TN > 128 and MP % TN:
        TN //= 2
    N_pad = _round_up(N, TM)
    ni, nj = N_pad // TM, MP // TN

    if (N_pad, KP) != (N, K):
        x2d = jnp.pad(x2d, ((0, N_pad - N), (0, KP - K)))
    if (KP, MP) != (K, M):
        wt = jnp.pad(wt, ((0, KP - K), (0, MP - M)))

    y_dtype = jnp.bfloat16 if itemsize < 4 else jnp.float32
    y_isz = jnp.dtype(y_dtype).itemsize
    est1 = (2 * (TM * TK + TK * TN) * itemsize
            + 2 * (TM * TN * y_isz + 8 * TN * 4) + TM * TN * 4)
    vmem1 = int(min(48 * 2**20, max(32 * 2**20, 2 * est1)))

    y2d, stats = pl.pallas_call(
        functools.partial(_matmul_stats_kernel, tm=TM, n_valid=N),
        out_shape=(jax.ShapeDtypeStruct((N_pad, MP), y_dtype),
                   jax.ShapeDtypeStruct((ni * 8, MP), jnp.float32)),
        grid=(ni, nj, nk),
        in_specs=[
            pl.BlockSpec((TM, TK), lambda i, j, k: (i, k)),
            pl.BlockSpec((TK, TN), lambda i, j, k: (k, j)),
        ],
        out_specs=[
            pl.BlockSpec((TM, TN), lambda i, j, k: (i, j)),
            pl.BlockSpec((8, TN), lambda i, j, k: (i, j)),
        ],
        scratch_shapes=[pltpu.VMEM((TM, TN), jnp.float32)],
        compiler_params=pltpu.CompilerParams(
            dimension_semantics=("parallel", "parallel", "arbitrary"),
            vmem_limit_bytes=vmem1,
        ),
    )(x2d, wt)

    # Merge per-tile stats (parallel-variance formula) and fold BN into
    # scale/shift: tiny (M,) vector math.
    stats = stats.reshape(ni, 8, MP)
    tile_sum, tile_ssd = stats[:, 0, :], stats[:, 1, :]
    counts = jnp.clip(N - jnp.arange(ni) * TM, 1, TM).astype(jnp.float32)[:, None]
    mean = jnp.sum(tile_sum, axis=0) / N
    tile_mean = tile_sum / counts
    m2 = jnp.sum(tile_ssd, axis=0) + jnp.sum(counts * (tile_mean - mean) ** 2, axis=0)
    var = m2 / N  # biased variance (what BatchNorm uses for normalization)
    # TODO(synk): BatchNorm1d running_mean/running_var (momentum, unbiased var)
    # are not updated; if added, fold the linear bias back into running_mean.
    if MP != M:
        gamma_f = jnp.pad(gamma_f, (0, MP - M))
        beta_f = jnp.pad(beta_f, (0, MP - M))
    scale_v = gamma_f * jax.lax.rsqrt(var + BN_EPS)
    shift_v = beta_f - mean * scale_v
    scale2d = scale_v.reshape(1, MP)
    shift2d = shift_v.reshape(1, MP)

    # pass 2: 1-D row grid, scale/shift resident, unpadded (N, M) output.
    TM2 = min(512, NP)
    bytes_per_row = MP * (2 * y_isz + 2 * 4)
    max_rows = max(8, int((24 * 2**20) // max(bytes_per_row, 1)) // 8 * 8)
    TM2 = min(TM2, max_rows)
    est2 = TM2 * bytes_per_row + 4 * MP * 4
    vmem2 = int(min(48 * 2**20, max(32 * 2**20, 2 * est2)))

    out2d = pl.pallas_call(
        _bn_relu_kernel,
        out_shape=jax.ShapeDtypeStruct((N, M), jnp.float32),
        grid=(pl.cdiv(N, TM2),),
        in_specs=[
            pl.BlockSpec((TM2, MP), lambda i: (i, 0)),
            pl.BlockSpec((1, MP), lambda i: (0, 0)),   # resident, never re-fetched
            pl.BlockSpec((1, MP), lambda i: (0, 0)),
        ],
        out_specs=pl.BlockSpec((TM2, M), lambda i: (i, 0)),
        compiler_params=pltpu.CompilerParams(
            dimension_semantics=("parallel",),
            vmem_limit_bytes=vmem2,
        ),
    )(y2d, scale2d, shift2d)

    # TODO(synk): dropout_p > 0 is not implemented (config uses dropout_p=0).
    return out2d.reshape(B, S, M)


def reference(x, weight, bias, gamma, beta):
    """Pure-JAX reference of the same forward pass (f32)."""
    y = jnp.einsum("bsk,mk->bsm", x, weight,
                   precision=jax.lax.Precision.HIGHEST) + bias
    mean = jnp.mean(y, axis=(0, 1), keepdims=True)
    var = jnp.mean((y - mean) ** 2, axis=(0, 1), keepdims=True)
    y = (y - mean) * jax.lax.rsqrt(var + BN_EPS) * gamma + beta
    return jnp.maximum(y, 0.0)


if __name__ == "__main__":
    # Small shapes consistent with the module: sequential input (B, S, C).
    B, S = 2, 8
    IN_FEATURES, OUT_FEATURES = 32, 32

    key = jax.random.PRNGKey(0)
    kx, kw, kb = jax.random.split(key, 3)

    x = jax.random.normal(kx, (B, S, IN_FEATURES), dtype=jnp.float32)
    bound = 1.0 / (IN_FEATURES ** 0.5)
    weight = jax.random.uniform(kw, (OUT_FEATURES, IN_FEATURES),
                                minval=-bound, maxval=bound, dtype=jnp.float32)
    bias = jax.random.uniform(kb, (OUT_FEATURES,), minval=-bound, maxval=bound,
                              dtype=jnp.float32)
    gamma = jnp.ones((OUT_FEATURES,), dtype=jnp.float32)   # BN weight init
    beta = jnp.zeros((OUT_FEATURES,), dtype=jnp.float32)   # BN bias init

    ref = reference(x, weight, bias, gamma, beta)

    # Default path: bf16 MXU operands, f32 accumulation (fused small-problem kernel).
    out = jax.block_until_ready(linear_block(x, weight, bias, gamma, beta))
    assert out.shape == (B, S, OUT_FEATURES)
    assert jnp.allclose(out, ref, atol=5e-2, rtol=5e-2), \
        float(jnp.max(jnp.abs(out - ref)))

    # f32 matmul-operand path.
    out_f32 = jax.block_until_ready(
        linear_block(x, weight, bias, gamma, beta, matmul_dtype=jnp.float32))
    assert jnp.allclose(out_f32, ref, atol=3e-2, rtol=3e-2), \
        float(jnp.max(jnp.abs(out_f32 - ref)))

    # Larger shape exercising the two-pass (tiled matmul + streaming BN/ReLU) path.
    B2, S2, K2, M2 = 2, 640, 128, 192
    k1, k2, k3, k4, k5 = jax.random.split(jax.random.PRNGKey(1), 5)
    x2 = jax.random.normal(k1, (B2, S2, K2), dtype=jnp.float32)
    b2d = 1.0 / (K2 ** 0.5)
    w2 = jax.random.uniform(k2, (M2, K2), minval=-b2d, maxval=b2d, dtype=jnp.float32)
    b2 = jax.random.uniform(k3, (M2,), minval=-0.1, maxval=0.1, dtype=jnp.float32)
    g2 = 1.0 + 0.5 * jax.random.normal(k4, (M2,), dtype=jnp.float32)
    be2 = 0.1 * jax.random.normal(k5, (M2,), dtype=jnp.float32)
    ref2 = reference(x2, w2, b2, g2, be2)
    out2 = jax.block_until_ready(linear_block(x2, w2, b2, g2, be2))
    assert out2.shape == (B2, S2, M2)
    assert jnp.allclose(out2, ref2, atol=6e-2, rtol=6e-2), \
        float(jnp.max(jnp.abs(out2 - ref2)))

    print("KERNEL_OK")
</pallas_src>

<mosaic_0001>
module attributes {stable_mosaic.version = 11 : i64} {
  func.func @_fused_linear_bn_relu_kernel(%arg0: i32, %arg1: memref<16x128xbf16, #tpu.memory_space<vmem>>, %arg2: memref<128x128xbf16, #tpu.memory_space<vmem>>, %arg3: memref<1x128xf32, #tpu.memory_space<vmem>>, %arg4: memref<1x128xf32, #tpu.memory_space<vmem>>, %arg5: memref<16x32xf32, #tpu.memory_space<vmem>>, %arg6: memref<16x128xf32, #tpu.memory_space<vmem>>) attributes {dimension_semantics = [#tpu.dimension_semantics<arbitrary>], iteration_bounds = array<i64: 1>, scalar_prefetch = 0 : i64, scratch_operands = 1 : i64, tpu.core_type = #tpu.core_type<tc>, window_params = [{transform_indices = @transform_0, window_bounds = array<i64: 16, 128>}, {transform_indices = @transform_1, window_bounds = array<i64: 128, 128>}, {pipeline_mode = #tpu.pipeline_mode<synchronous>, transform_indices = @transform_2, window_bounds = array<i64: 1, 128>}, {pipeline_mode = #tpu.pipeline_mode<synchronous>, transform_indices = @transform_3, window_bounds = array<i64: 1, 128>}, {pipeline_mode = #tpu.pipeline_mode<synchronous>, transform_indices = @transform_4, window_bounds = array<i64: 16, 32>}]} {
    %c0_i32 = arith.constant 0 : i32
    %0 = arith.cmpi eq, %arg0, %c0_i32 : i32
    %1 = arith.extui %0 : i1 to i32
    %c0_i32_0 = arith.constant 0 : i32
    %2 = arith.cmpi ne, %1, %c0_i32_0 : i32
    scf.if %2 {
      %cst_10 = arith.constant 0.000000e+00 : f32
      %12 = vector.broadcast %cst_10 : f32 to vector<16x128xf32>
      %c0_11 = arith.constant 0 : index
      %c0_12 = arith.constant 0 : index
      %13 = vector.load %arg6[%c0_11, %c0_12] : memref<16x128xf32, #tpu.memory_space<vmem>>, vector<16x128xf32>
      tpu.vector_store %arg6[%c0_11, %c0_12], %12 {strides = array<i32>} : memref<16x128xf32, #tpu.memory_space<vmem>>, vector<16x128xf32>,
    } else {
    }
    %c0 = arith.constant 0 : index
    %c0_1 = arith.constant 0 : index
    %3 = vector.load %arg6[%c0, %c0_1] : memref<16x128xf32, #tpu.memory_space<vmem>>, vector<16x128xf32>
    %c0_2 = arith.constant 0 : index
    %c0_3 = arith.constant 0 : index
    %4 = vector.load %arg1[%c0_2, %c0_3] : memref<16x128xbf16, #tpu.memory_space<vmem>>, vector<16x128xbf16>
    %c0_4 = arith.constant 0 : index
    %c0_5 = arith.constant 0 : index
    %5 = vector.load %arg2[%c0_4, %c0_5] : memref<128x128xbf16, #tpu.memory_space<vmem>>, vector<128x128xbf16>
    %cst = arith.constant dense<0.000000e+00> : vector<16x128xf32>
    %6 = tpu.matmul %4, %5, %cst {dimension_numbers = #tpu.dot_dimension_numbers<[1], [0], [0], [1], [0, 0, 1, 1], [], []>} : vector<16x128xbf16>, vector<128x128xbf16>, vector<16x128xf32> -> vector<16x128xf32>
    %7 = arith.addf %3, %6 : vector<16x128xf32>
    %c0_6 = arith.constant 0 : index
    %c0_7 = arith.constant 0 : index
    %8 = vector.load %arg6[%c0_6, %c0_7] : memref<16x128xf32, #tpu.memory_space<vmem>>, vector<16x128xf32>
    tpu.vector_store %arg6[%c0_6, %c0_7], %7 {strides = array<i32>} : memref<16x128xf32, #tpu.memory_space<vmem>>, vector<16x128xf32>,
    %c0_i32_8 = arith.constant 0 : i32
    %9 = arith.cmpi eq, %arg0, %c0_i32_8 : i32
    %10 = arith.extui %9 : i1 to i32
    %c0_i32_9 = arith.constant 0 : i32
    %11 = arith.cmpi ne, %10, %c0_i32_9 : i32
    scf.if %11 {
      %c0_10 = arith.constant 0 : index
      %c0_11 = arith.constant 0 : index
      %12 = vector.load %arg6[%c0_10, %c0_11] : memref<16x128xf32, #tpu.memory_space<vmem>>, vector<16x128xf32>
      %13 = tpu.iota {dimensions = array<i32: 0>} : vector<16x128xi32>
      %c16_i32 = arith.constant 16 : i32
      %14 = vector.broadcast %c16_i32 : i32 to vector<16x128xi32>
      %15 = arith.cmpi slt, %13, %14 : vector<16x128xi32>
      %cst_12 = arith.constant 0.000000e+00 : f32
      %16 = vector.broadcast %cst_12 : f32 to vector<16x128xf32>
      %17 = arith.select %15, %12, %16 : vector<16x128xi1>, vector<16x128xf32>
      %cst_13 = arith.constant dense<0.000000e+00> : vector<128xf32>
      %18 = vector.multi_reduction <add>, %17, %cst_13 [0] : vector<16x128xf32> to vector<128xf32>
      %19 = vector.shape_cast %18 : vector<128xf32> to vector<1x128xf32>
      %cst_14 = arith.constant 6.250000e-02 : f32
      %20 = vector.broadcast %cst_14 : f32 to vector<1x128xf32>
      %21 = arith.mulf %19, %20 : vector<1x128xf32>
      %22 = vector.broadcast %21 : vector<1x128xf32> to vector<16x128xf32>
      %23 = arith.subf %12, %22 : vector<16x128xf32>
      %cst_15 = arith.constant 0.000000e+00 : f32
      %24 = vector.broadcast %cst_15 : f32 to vector<16x128xf32>
      %25 = arith.select %15, %23, %24 : vector<16x128xi1>, vector<16x128xf32>
      %26 = arith.mulf %25, %25 : vector<16x128xf32>
      %cst_16 = arith.constant dense<0.000000e+00> : vector<128xf32>
      %27 = vector.multi_reduction <add>, %26, %cst_16 [0] : vector<16x128xf32> to vector<128xf32>
      %28 = vector.shape_cast %27 : vector<128xf32> to vector<1x128xf32>
      %cst_17 = arith.constant 6.250000e-02 : f32
      %29 = vector.broadcast %cst_17 : f32 to vector<1x128xf32>
      %30 = arith.mulf %28, %29 : vector<1x128xf32>
      %c0_18 = arith.constant 0 : index
      %c0_19 = arith.constant 0 : index
      %31 = vector.load %arg3[%c0_18, %c0_19] : memref<1x128xf32, #tpu.memory_space<vmem>>, vector<1x128xf32>
      %cst_20 = arith.constant 9.99999974E-6 : f32
      %32 = vector.broadcast %cst_20 : f32 to vector<1x128xf32>
      %33 = arith.addf %30, %32 : vector<1x128xf32>
      %34 = math.rsqrt %33 : vector<1x128xf32>
      %35 = arith.mulf %31, %34 : vector<1x128xf32>
      %c0_21 = arith.constant 0 : index
      %c0_22 = arith.constant 0 : index
      %36 = vector.load %arg4[%c0_21, %c0_22] : memref<1x128xf32, #tpu.memory_space<vmem>>, vector<1x128xf32>
      %37 = arith.mulf %21, %35 : vector<1x128xf32>
      %38 = arith.subf %36, %37 : vector<1x128xf32>
      %39 = vector.broadcast %35 : vector<1x128xf32> to vector<16x128xf32>
      %40 = arith.mulf %12, %39 : vector<16x128xf32>
      %41 = vector.broadcast %38 : vector<1x128xf32> to vector<16x128xf32>
      %42 = arith.addf %40, %41 : vector<16x128xf32>
      %cst_23 = arith.constant 0.000000e+00 : f32
      %43 = vector.broadcast %cst_23 : f32 to vector<16x128xf32>
      %44 = arith.maximumf %42, %43 : vector<16x128xf32>
      %45 = vector.extract_strided_slice %44 {offsets = [0, 0], sizes = [16, 32], strides = [1, 1]} : vector<16x128xf32> to vector<16x32xf32>
      %c0_24 = arith.constant 0 : index
      %c0_25 = arith.constant 0 : index
      %46 = vector.load %arg5[%c0_24, %c0_25] : memref<16x32xf32, #tpu.memory_space<vmem>>, vector<16x32xf32>
      tpu.vector_store %arg5[%c0_24, %c0_25], %45 {strides = array<i32>} : memref<16x32xf32, #tpu.memory_space<vmem>>, vector<16x32xf32>,
    } else {
    }
    return
  }
  func.func @transform_0(%arg0: i32) -> (i32, i32) {
    %c0_i32 = arith.constant 0 : i32
    %c0_i32_0 = arith.constant 0 : i32
    return %c0_i32, %arg0 : i32, i32
  }
  func.func @transform_1(%arg0: i32) -> (i32, i32) {
    %c0_i32 = arith.constant 0 : i32
    %c0_i32_0 = arith.constant 0 : i32
    return %arg0, %c0_i32 : i32, i32
  }
  func.func @transform_2(%arg0: i32) -> (i32, i32) {
    %c0_i32 = arith.constant 0 : i32
    %c0_i32_0 = arith.constant 0 : i32
    %c0_i32_1 = arith.constant 0 : i32
    return %c0_i32, %c0_i32_0 : i32, i32
  }
  func.func @transform_3(%arg0: i32) -> (i32, i32) {
    %c0_i32 = arith.constant 0 : i32
    %c0_i32_0 = arith.constant 0 : i32
    %c0_i32_1 = arith.constant 0 : i32
    return %c0_i32, %c0_i32_0 : i32, i32
  }
  func.func @transform_4(%arg0: i32) -> (i32, i32) {
    %c0_i32 = arith.constant 0 : i32
    %c0_i32_0 = arith.constant 0 : i32
    %c0_i32_1 = arith.constant 0 : i32
    return %c0_i32, %c0_i32_0 : i32, i32
  }
}

</mosaic_0001>

<bundles_post_ra>
// kernel: linear_block.1
= control target key start
LH: loop header
LB: loop body
LE: loop exit
PB: predicated region body
PF: predicated region fallthrough
CT: control target
= control target key end

     0   :  { %v300_v1 = vmov 0.0   ;;  %vm301_vm0 = vmmov 0   ;;  %s375_s0 = inlined_call_operand.vmem [shape: bf16[16,128], index: 0, kind: input, shape index: {}]   ;;  %s376_s1 = inlined_call_operand.vmem [shape: bf16[128,128], index: 1, kind: input, shape index: {}]   ;;  %s377_s2 = inlined_call_operand.vmem [shape: f32[1,128], index: 2, kind: input, shape index: {}]   ;;  %s378_s3 = inlined_call_operand.vmem [shape: f32[1,128], index: 3, kind: input, shape index: {}]   ;;  %s379_s4 = inlined_call_operand.hbm [shape: f32[16,32], index: 4, kind: output, shape index: {}]  }
   0x1   :  { %v265_v0 = vld [vmem:[%s376_s1] sm:$0xff]   ;;  %240 = vmatprep.subr.bf16.mxu0 %v300_v1  ;;  %v266_v2 = vld [vmem:[%s376_s1 + $0x8] sm:$0xff]   ;;  %256 = vmatprep.mubr.msk.bf16.mxu0 %vm301_vm0, %v300_v1  ;;  %v267_v3 = vld [vmem:[%s376_s1 + $0x10] sm:$0xff]  }
   0x2   :  { %241 = vmatpush3.bf16.msra.mxu0 %v265_v0 }
   0x3   :  { %242 = vmatprep.subr.bf16.mxu0 %v300_v1 }
   0x6   :  { %243 = vmatpush3.bf16.msra.mxu0 %v266_v2 }
   0x7   :  { %244 = vmatprep.subr.bf16.mxu0 %v300_v1 }
   0x8   :  { %9 = vsyncpa [#allocation4], 0  ;;  %v268_v4 = vld [vmem:[%s376_s1 + $0x18] sm:$0xff]   ;;  %v269_v5 = vld [vmem:[%s376_s1 + $0x20] sm:$0xff]   ;;  %v186_v35 = vlaneseq  ;;  %s302_s9 = smov [#allocation3]   ;;  %vm203_vm1 = vcmask 261120  }
   0x9   :  { %v270_v6 = vld [vmem:[%s376_s1 + $0x28] sm:$0xff]   ;;  %v271_v7 = vld [vmem:[%s376_s1 + $0x30] sm:$0xff]   ;;  %v272_v8 = vld [vmem:[%s376_s1 + $0x38] sm:$0xff]   ;;  %s211_s10 = sshll.u32 %s302_s9, 4  ;;  %s212_s10 = int_to_ptr.vmem [resolvable:$true] %s211_s10 }
   0xa   :  { %245 = vmatpush3.bf16.msra.mxu0 %v267_v3  ;;  %v273_v9 = vld [vmem:[%s375_s0] sm:$0xff]   ;;  %v187_v36 = vshrl.u32 %v186_v35, 7  ;;  %p281_p1 = scmp.lt.s32.totalorder %s212_s10, %s212_s10 }
   0xb   :  { %246 = vmatprep.subr.bf16.mxu0 %v300_v1  ;;  %v178_v37 = vld [vmem:[%s377_s2] sm:$0x1]  ;;  %s276_s2 = scalar_lea.vmem %s212_s10, 256 }
   0xc   :  { %v188_v38 = vsub.s32 0, %v187_v36  ;;  %v182_v41 = vld [vmem:[%s378_s3] sm:$0x1]  ;;  %p277_p0 = scmp.ne.s32.totalorder %s212_s10, %s276_s2  ;;  %p282_p2 = scmp.lt.s32.totalorder %s276_s2, %s276_s2 }
   0xe   :  { %247 = vmatpush3.bf16.msra.mxu0 %v268_v4  ;;  %p283_p3 = por %p282_p2, %p281_p1 }
   0xf   :  { %248 = vmatprep.subr.bf16.mxu0 %v300_v1 }
  0x10   :  { %p284_p4 = pnand %p283_p3, %p277_p0 }
  0x12   :  { %249 = vmatpush3.bf16.msra.mxu0 %v269_v5 }
  0x13   :  { %250 = vmatprep.subr.bf16.mxu0 %v300_v1 }
  0x16   :  { %251 = vmatpush3.bf16.msra.mxu0 %v270_v6 }
  0x17   :  { %252 = vmatprep.subr.bf16.mxu0 %v300_v1 }
  0x1a   :  { %253 = vmatpush3.bf16.msra.mxu0 %v271_v7 }
  0x1b   :  { %254 = vmatprep.subr.bf16.mxu0 %v300_v1 }
  0x1e   :  { %255 = vmatpush3.bf16.msra.mxu0 %v272_v8 }
  0x21   :  { %257 = vmatmul.mubr.bf16.vlgmr.msra.gmra.mrb[0].mxu0 %v273_v9 }
  0xf4   :  { %v133_v10 = vpop.f32.mrb[0].mxu0 }
  0xf5   :  { %v258_v11 = vpop.f32.mrb[1].mxu0 }
  0xf6   :  { %v136_v12 = vpop.f32.mrb[2].mxu0 }
  0xf7   :  { %v156_v13 = vadd.f32 %v136_v12, %v133_v10  ;;  %v259_v14 = vpop.f32.mrb[3].mxu0 }
  0xf9   :  { %v157_v15 = vrot.slane %v156_v13, 4 }
  0xfb   :  { %v158_v16 = vadd.f32 %v157_v15, %v156_v13 }
  0xfd   :  { %v159_v17 = vrot.slane %v158_v16, 2 }
  0xff   :  { %v160_v18 = vadd.f32 %v159_v17, %v158_v16 }
 0x101   :  { %v161_v19 = vrot.slane %v160_v18, 1 }
 0x103   :  { %v162_v20 = vadd.f32 %v161_v19, %v160_v18 }
 0x105   :  { %v163_v21 = vmul.f32 0.0625, %v162_v20 }
 0x107   :  { %v164_v22 = vsub.f32 %v133_v10, %v163_v21  ;;  %v165_v23 = vsub.f32 %v136_v12, %v163_v21 }
 0x109   :  { %v168_v24 = vmul.f32 %v164_v22, %v164_v22  ;;  %v169_v25 = vmul.f32 %v165_v23, %v165_v23 }
 0x10b   :  { %v170_v26 = vadd.f32 %v169_v25, %v168_v24 }
 0x10d   :  { %v171_v27 = vrot.slane %v170_v26, 4 }
 0x10f   :  { %v172_v28 = vadd.f32 %v171_v27, %v170_v26 }
 0x111   :  { %v173_v29 = vrot.slane %v172_v28, 2 }
 0x113   :  { %v174_v30 = vadd.f32 %v173_v29, %v172_v28 }
 0x115   :  { %v175_v31 = vrot.slane %v174_v30, 1 }
 0x117   :  { %v176_v32 = vadd.f32 %v175_v31, %v174_v30 }
 0x119   :  { %v177_v33 = vmul.f32 0.0625, %v176_v32 }
 0x11b   :  { %v179_v34 = vadd.f32 1e-05, %v177_v33 }
 0x11d   :  { %274 = vrsqrt.f32 %v179_v34 }
 0x127   :  { %v275_v39 = vpop.eup %274 }
 0x128   :  { %v181_v40 = vmul.f32 %v275_v39, %v178_v37 }
 0x12a   :  { %v183_v42 = vmul.f32 %v181_v40, %v163_v21  ;;  %v189_v43 = vrot.slane %v181_v40, %v188_v38 }
 0x12c   :  { %v184_v44 = vsub.f32 %v182_v41, %v183_v42  ;;  %v191_v45 = vmul.f32 %v189_v43, %v133_v10  ;;  %v192_v46 = vmul.f32 %v189_v43, %v136_v12 }
 0x12e   :  { %v197_v47 = vrot.slane %v184_v44, %v188_v38 }
 0x130   :  { %v199_v48 = vadd.f32 %v197_v47, %v191_v45  ;;  %v200_v49 = vadd.f32 %v197_v47, %v192_v46 }
 0x132   :  { %v201_v50 = vmax.f32 %v199_v48, 0.0  ;;  %v202_v51 = vmax.f32 %v200_v49, 0.0 }
 0x134   :  { %205 = vst.msk [vmem:[#allocation3 + $0x8] sm:$0xff] %vm203_vm1, %v202_v51  ;;  %204 = vst.msk [vmem:[#allocation3] sm:$0xff] %vm203_vm1, %v201_v50 }
 0x135   :  { %287 = shalt.err (!%p284_p4)
}
 0x136   :  { %s288_s12 = scalar_lea.hbm %s379_s4, 256 }
 0x137   :  { %p289_p5 = scmp.ne.s32.totalorder %s379_s4, %s288_s12  ;;  %p292_p6 = scmp.lt.u32.totalorder %s288_s12, %s379_s4 }
 0x139   :  { %p294_p7 = pnand %p292_p6, %p289_p5 }
 0x13b   :  { %297 = shalt.err (!%p294_p7)
}
 0x13c   :  { %s303_s17 = smov 128   ;;  %s304_s18 = smov 8  }
 0x13d   :  { %217 = dma.vmem_to_hbm [thread:$0]  %s212_s10, 256, %s379_s4, [#allocation4], %s303_s17, %s303_s17, %s304_s18  }
 0x13e   :  { %298 = dma.done.wait [#allocation4], 256  }
 0x13f   :  { %299 = vsyncadd [#allocation4], 4294967040 }
 0x140   :  { %221 = vsyncpa [#allocation4], 1 }

</bundles_post_ra>
